<compile_context>
chip_gen: v7x
topology: tpu7x:2x2x1
jax: 0.10.0
libtpu: 0.0.40
codegen_flags: <defaults>
</compile_context>

<pallas_src>
import jax
import jax.numpy as jnp
from jax.experimental import pallas as pl
from jax.experimental.pallas import tpu as pltpu

LANES = 128        # vreg lane width
SUBLANES = 8       # vreg sublane count for 32-bit dtypes
MIN_PALLAS_ELEMS = 1 << 17   # below this, plain jnp is strictly faster


def affine_kernel(wb_ref, x_ref, y_ref):
    # wb_ref: (2,) f32 in SMEM -> [w, b]
    # x_ref / y_ref: (tr, 128) f32 VMEM tiles
    w = wb_ref[0]
    b = wb_ref[1]
    y_ref[...] = x_ref[...] * w + b


def my_model_forward(x, weight, bias, *, tile_rows=2048, force_pallas=False):
    """x: (B, 1) f32, weight: (1, 1) f32 (OUT, IN), bias: (1,) f32 -> [y, x]."""
    B, in_f = x.shape
    out_f = weight.shape[0]
    assert in_f == 1 and out_f == 1, "MyModel uses nn.Linear(1, 1)"
    assert x.dtype == jnp.float32, "kernel path assumes f32 (8-row sublane granule)"

    n = B * in_f

    # ---- small-input fast path: launch overhead >> two VPU ops ----
    if n < MIN_PALLAS_ELEMS and not force_pallas:
        w = weight.reshape(()).astype(x.dtype)
        b = bias.reshape(()).astype(x.dtype)
        y = x * w + b
        return [y, x]

    # Scalar parameters -> one (2,) SMEM array; no VMEM tile, no matrix DMA.
    wb = jnp.concatenate([weight.reshape(-1), bias.reshape(-1)]).astype(x.dtype)

    # ---- lane-dense repacking: (B, 1) -> (rows_padded, 128) slab ----
    rows_needed = pl.cdiv(n, LANES)
    rows_padded = pl.cdiv(rows_needed, SUBLANES) * SUBLANES  # mult of 8 sublanes
    n_padded = rows_padded * LANES

    # tile rows: multiple of the 8-row sublane granule, capped at `tile_rows`
    tr = min(tile_rows, rows_padded)
    tr = max(SUBLANES, (tr // SUBLANES) * SUBLANES)
    num_tiles = pl.cdiv(rows_padded, tr)   # last tile may be partial (masked)

    aligned = (n == n_padded)              # static Python check
    x_flat = x.reshape(-1)
    if aligned:
        x_slab = x_flat.reshape(rows_padded, LANES)          # free reshape
    else:
        x_slab = jnp.pad(x_flat, (0, n_padded - n)).reshape(rows_padded, LANES)

    y_slab = pl.pallas_call(
        affine_kernel,
        out_shape=jax.ShapeDtypeStruct((rows_padded, LANES), x.dtype),
        grid=(num_tiles,),
        in_specs=[
            pl.BlockSpec(memory_space=pltpu.MemorySpace.SMEM),    # [w, b] scalars
            pl.BlockSpec((tr, LANES), lambda i: (i, 0)),          # x tile
        ],
        out_specs=pl.BlockSpec((tr, LANES), lambda i: (i, 0)),    # y tile
        compiler_params=pltpu.CompilerParams(
            dimension_semantics=("parallel",),                    # megacore on v7x
        ),
    )(wb, x_slab)

    # Restore the (B, 1) nn.Linear output layout (slice only if we padded).
    if aligned:
        y = y_slab.reshape(B, out_f)
    else:
        y = y_slab.reshape(-1)[:n].reshape(B, out_f)

    # Forward returns a list: [y, x]  (x passed through untouched)
    return [y, x]


if __name__ == "__main__":
    key = jax.random.PRNGKey(0)
    kx, kw, kb = jax.random.split(key, 3)

    # Small shapes consistent with nn.Linear(1, 1): batch=2, features=1
    B, IN, OUT = 2, 1, 1
    x = jax.random.normal(kx, (B, IN), dtype=jnp.float32)
    weight = jax.random.normal(kw, (OUT, IN), dtype=jnp.float32)  # (OUT, IN)
    bias = jax.random.normal(kb, (OUT,), dtype=jnp.float32)       # (OUT,)
    y_ref = x @ weight.T + bias

    # 1) default path on the module's real tiny shape (plain-jnp fast path)
    y_fast, x_fast = my_model_forward(x, weight, bias)
    jax.block_until_ready(y_fast)
    assert jnp.allclose(y_fast, y_ref, atol=1e-6), "fast-path mismatch"
    assert jnp.array_equal(x_fast, x), "fast-path passthrough mismatch"

    # 2) force the Pallas kernel on the small shape (single (8,128) tile)
    y_small, x_small = my_model_forward(x, weight, bias, force_pallas=True)
    jax.block_until_ready(y_small)
    jax.block_until_ready(x_small)
    assert jnp.allclose(y_small, y_ref, atol=1e-6), "pallas small mismatch"
    assert jnp.array_equal(x_small, x), "pallas small passthrough mismatch"

    # 3) aligned large batch: zero-copy reshape path, single full-size tile
    B2 = 2048 * 128  # multiple of 8*128 -> no pad, no output slice
    x2 = jax.random.normal(jax.random.PRNGKey(1), (B2, IN), dtype=jnp.float32)
    y2, x2_out = my_model_forward(x2, weight, bias)
    jax.block_until_ready(y2)
    y2_ref = x2 @ weight.T + bias
    assert jnp.allclose(y2, y2_ref, atol=1e-6), "pallas aligned mismatch"
    assert jnp.array_equal(x2_out, x2), "pallas aligned passthrough mismatch"

    # 4) ragged large batch: tail pad + multi-tile grid with partial last tile
    B3 = 2048 * 128 + 1000
    x3 = jax.random.normal(jax.random.PRNGKey(2), (B3, IN), dtype=jnp.float32)
    y3, x3_out = my_model_forward(x3, weight, bias)
    jax.block_until_ready(y3)
    y3_ref = x3 @ weight.T + bias
    assert jnp.allclose(y3, y3_ref, atol=1e-6), "pallas ragged mismatch"
    assert jnp.array_equal(x3_out, x3), "pallas ragged passthrough mismatch"

    print("KERNEL_OK")
</pallas_src>

<mosaic_0001>
module attributes {stable_mosaic.version = 11 : i64} {
  func.func @affine_kernel(%arg0: i32, %arg1: memref<2xf32, #tpu.memory_space<smem>>, %arg2: memref<8x128xf32, #tpu.memory_space<vmem>>, %arg3: memref<8x128xf32, #tpu.memory_space<vmem>>) attributes {dimension_semantics = [#tpu.dimension_semantics<parallel>], iteration_bounds = array<i64: 1>, scalar_prefetch = 0 : i64, scratch_operands = 0 : i64, tpu.core_type = #tpu.core_type<tc>, window_params = [{transform_indices = @transform_0, window_bounds = array<i64: 2>}, {transform_indices = @transform_1, window_bounds = array<i64: 8, 128>}, {transform_indices = @transform_2, window_bounds = array<i64: 8, 128>}]} {
    %c0 = arith.constant 0 : index
    %0 = memref.load %arg1[%c0] : memref<2xf32, #tpu.memory_space<smem>>
    %c1 = arith.constant 1 : index
    %1 = memref.load %arg1[%c1] : memref<2xf32, #tpu.memory_space<smem>>
    %c0_0 = arith.constant 0 : index
    %c0_1 = arith.constant 0 : index
    %2 = vector.load %arg2[%c0_0, %c0_1] : memref<8x128xf32, #tpu.memory_space<vmem>>, vector<8x128xf32>
    %3 = vector.broadcast %0 : f32 to vector<8x128xf32>
    %4 = arith.mulf %2, %3 : vector<8x128xf32>
    %5 = vector.broadcast %1 : f32 to vector<8x128xf32>
    %6 = arith.addf %4, %5 : vector<8x128xf32>
    %c0_2 = arith.constant 0 : index
    %c0_3 = arith.constant 0 : index
    %7 = vector.load %arg3[%c0_2, %c0_3] : memref<8x128xf32, #tpu.memory_space<vmem>>, vector<8x128xf32>
    tpu.vector_store %arg3[%c0_2, %c0_3], %6 {strides = array<i32>} : memref<8x128xf32, #tpu.memory_space<vmem>>, vector<8x128xf32>,
    return
  }
  func.func @transform_0(%arg0: i32) -> i32 {
    %c0_i32 = arith.constant 0 : i32
    %c0_i32_0 = arith.constant 0 : i32
    return %c0_i32 : i32
  }
  func.func @transform_1(%arg0: i32) -> (i32, i32) {
    %c0_i32 = arith.constant 0 : i32
    %c0_i32_0 = arith.constant 0 : i32
    return %arg0, %c0_i32 : i32, i32
  }
  func.func @transform_2(%arg0: i32) -> (i32, i32) {
    %c0_i32 = arith.constant 0 : i32
    %c0_i32_0 = arith.constant 0 : i32
    return %arg0, %c0_i32 : i32, i32
  }
}

</mosaic_0001>

<bundles_post_ra>
// kernel: tpu_custom_call.1
= control target key start
LH: loop header
LB: loop body
LE: loop exit
PB: predicated region body
PF: predicated region fallthrough
CT: control target
= control target key end

     0   :  { %7 = vsyncpa [#allocation5], 0  ;;  %s177_s0 = inlined_call_operand.hbm [shape: f32[2], index: 0, kind: input, shape index: {}]   ;;  %s178_s1 = inlined_call_operand.hbm [shape: f32[8,128], index: 1, kind: input, shape index: {}]   ;;  %s179_s2 = inlined_call_operand.hbm [shape: f32[8,128], index: 2, kind: output, shape index: {}]  }
   0x1   :  { %8 = vsyncpa [#allocation3], 0 }
   0x2   :  { %9 = vsyncpa [#allocation4], 0  ;;  %s63_s11 = scalar_lea.hbm %s177_s0, 16 }
   0x3   :  { %p64_p0 = scmp.ne.s32.totalorder %s177_s0, %s63_s11  ;;  %p67_p1 = scmp.lt.u32.totalorder %s63_s11, %s177_s0 }
   0x5   :  { %p69_p2 = pnand %p67_p1, %p64_p0 }
   0x7   :  { %72 = shalt.err (!%p69_p2)
}
   0x8   :  { %s123_s16 = smov [#allocation2]   ;;  %s124_s19 = smov [#allocation6]  }
   0x9   :  { %17 = dma.hbm_to_smem %s177_s0, 16, %s123_s16, [#allocation5]  }
   0xa   :  { %s24_s20 = sshll.u32 %s124_s19, 4  ;;  %s73_s23 = scalar_lea.hbm %s178_s1, 128  ;;  %s25_s20 = int_to_ptr.vmem [resolvable:$true] %s24_s20 }
   0xb   :  { %p74_p3 = scmp.ne.s32.totalorder %s178_s1, %s73_s23  ;;  %p77_p4 = scmp.lt.u32.totalorder %s73_s23, %s178_s1 }
   0xd   :  { %p79_p5 = pnand %p77_p4, %p74_p3 }
   0xf   :  { %82 = shalt.err (!%p79_p5)
}
  0x10   :  { %s83_s28 = scalar_lea.vmem %s25_s20, 128  ;;  %p88_p7 = scmp.lt.s32.totalorder %s25_s20, %s25_s20 }
  0x11   :  { %p84_p6 = scmp.ne.s32.totalorder %s25_s20, %s83_s28  ;;  %p89_p8 = scmp.lt.s32.totalorder %s83_s28, %s83_s28 }
  0x13   :  { %p90_p9 = por %p89_p8, %p88_p7 }
  0x15   :  { %p91_p10 = pnand %p90_p9, %p84_p6 }
  0x17   :  { %94 = shalt.err (!%p91_p10)
}
  0x18   :  { %27 = dma.hbm_to_vmem [thread:$0]  %s178_s1, 128, %s25_s20, [#allocation3]  }
  0x19   :  { %117 = dma.done.wait [#allocation5], 16  }
  0x1a   :  { %118 = vsyncadd [#allocation5], 4294967280 }
  0x1b   :  { %119 = dma.done.wait [#allocation3], 128  }
  0x1c   :  { %120 = vsyncadd [#allocation3], 4294967168 }
  0x1d   :  { %34 = sfence }
  0x1e   :  { %s35_s30 = sld [smem:[#allocation2]]  ;;  %s59_s3 = sld [smem:[#allocation2 + $0x1]]  ;;  %v37_v0 = vld [vmem:[#allocation6] sm:$0xff] }
  0x1f   :  { %s125_s4 = smov [#allocation7]  }
  0x20   :  { %s49_s5 = sshll.u32 %s125_s4, 4  ;;  %s50_s5 = int_to_ptr.vmem [resolvable:$true] %s49_s5 }
  0x21   :  { %s95_s6 = scalar_lea.vmem %s50_s5, 128  ;;  %p100_p12 = scmp.lt.s32.totalorder %s50_s5, %s50_s5 }
  0x22   :  { %p96_p11 = scmp.ne.s32.totalorder %s50_s5, %s95_s6  ;;  %p101_p13 = scmp.lt.s32.totalorder %s95_s6, %s95_s6 }
  0x24   :  { %v38_v1 = vstv %s35_s30  ;;  %v40_v2 = vstv %s59_s3  ;;  %p102_p0 = por %p101_p13, %p100_p12 }
  0x25   :  { %v39_v3 = vmul.f32 %v38_v1, %v37_v0 }
  0x26   :  { %p103_p1 = pnand %p102_p0, %p96_p11 }
  0x27   :  { %v41_v4 = vadd.f32 %v40_v2, %v39_v3 }
  0x29   :  { %42 = vst [vmem:[#allocation7] sm:$0xff] %v41_v4 }
  0x2a   :  { %106 = shalt.err (!%p103_p1)
}
  0x2b   :  { %s107_s8 = scalar_lea.hbm %s179_s2, 128 }
  0x2c   :  { %p108_p2 = scmp.ne.s32.totalorder %s179_s2, %s107_s8  ;;  %p111_p3 = scmp.lt.u32.totalorder %s107_s8, %s179_s2 }
  0x2e   :  { %p113_p4 = pnand %p111_p3, %p108_p2 }
  0x30   :  { %116 = shalt.err (!%p113_p4)
}
  0x31   :  { %52 = dma.vmem_to_hbm [thread:$0]  %s50_s5, 128, %s179_s2, [#allocation4]  }
  0x32   :  { %121 = dma.done.wait [#allocation4], 128  }
  0x33   :  { %122 = vsyncadd [#allocation4], 4294967168 }
  0x34   :  { %56 = vsyncpa [#allocation3], 1 }
  0x35   :  { %57 = vsyncpa [#allocation4], 1 }
  0x36   :  { %58 = vsyncpa [#allocation5], 1 }

</bundles_post_ra>
